<compile_context>
chip_gen: v7x
topology: tpu7x:2x2x1
jax: 0.10.0
libtpu: 0.0.40
codegen_flags: <defaults>
</compile_context>

<pallas_src>
import functools

import jax
import jax.numpy as jnp
import numpy as np
from jax.experimental import pallas as pl
from jax.experimental.pallas import tpu as pltpu


def _dice_kernel(p_ref, t_ref, num_out_ref, den_out_ref, num_acc, den_acc):
    j = pl.program_id(1)

    @pl.when(j == 0)
    def _init():
        num_acc[...] = jnp.zeros_like(num_acc)
        den_acc[...] = jnp.zeros_like(den_acc)

    p = p_ref[...]                        # (C, T) f32 logits tile
    t = t_ref[...].astype(jnp.float32)    # (C, T) bf16 one-hot -> f32 (exact for 0/1)

    # softmax over the class axis (axis 0), column-wise -> safe to do per tile
    m = jnp.max(p, axis=0, keepdims=True)
    e = jnp.exp(p - m)
    s = e * pl.reciprocal(jnp.sum(e, axis=0, keepdims=True))  # exact recip on EUP

    # deferred lane reduction: pure VPU adds per grid step
    num_acc[...] += s * t
    den_acc[...] += s * s + t * t

    @pl.when(j == pl.num_programs(1) - 1)
    def _finalize():
        c = num_acc.shape[0]
        num_out_ref[...] = jnp.sum(num_acc[...], axis=1, keepdims=True).reshape(1, c, 1)
        den_out_ref[...] = jnp.sum(den_acc[...], axis=1, keepdims=True).reshape(1, c, 1)


def _pick_tile(hw, c, max_tile):
    """Largest lane tile that divides hw, is <= max_tile and fits a VMEM budget."""
    # Per-column bytes: f32 predict (x2 bufs) + bf16 target (x2 bufs) + 2 f32 accumulators.
    per_col_bytes = c * (2 * 4 + 2 * 2 + 2 * 4)
    budget_tile = max(128, (20 << 20) // per_col_bytes)   # ~20 MiB, safe on v7x's 64 MiB VMEM
    cap = min(max_tile, budget_tile)
    if hw <= cap:
        return hw                                         # full row (escape-clause block)
    t = cap - cap % 128
    while t >= 128:
        if hw % t == 0:
            return t
        t -= 128
    # TODO(synk): ragged spatial sizes (no 128-multiple divisor) are not tiled;
    #             fall back to streaming the full row per step.
    return hw


def dice_loss(predict, target, *, smooth=1.0, max_tile=8192):
    """predict, target: [N, C, *] (same shape); returns scalar float32 loss."""
    assert predict.shape == target.shape, "predict & target shape do not match"
    N, C = predict.shape[0], predict.shape[1]
    HW = int(np.prod(predict.shape[2:])) if predict.ndim > 2 else 1

    # Free reshapes (contiguous): no HBM transpose pass.
    p = predict.reshape(N, C, HW).astype(jnp.float32)
    # Target is documented one-hot -> bf16 is exact and halves target HBM traffic.
    t = target.reshape(N, C, HW).astype(jnp.bfloat16)

    tile = _pick_tile(HW, C, max_tile)
    grid = (N, HW // tile)

    num_p, den_p = pl.pallas_call(
        _dice_kernel,
        out_shape=(
            jax.ShapeDtypeStruct((N, C, 1), jnp.float32),
            jax.ShapeDtypeStruct((N, C, 1), jnp.float32),
        ),
        grid_spec=pltpu.PrefetchScalarGridSpec(
            num_scalar_prefetch=0,
            grid=grid,
            in_specs=[
                pl.BlockSpec((pl.Squeezed(), C, tile), lambda n, j: (n, 0, j)),
                pl.BlockSpec((pl.Squeezed(), C, tile), lambda n, j: (n, 0, j)),
            ],
            out_specs=[
                pl.BlockSpec((1, C, 1), lambda n, j: (n, 0, 0)),
                pl.BlockSpec((1, C, 1), lambda n, j: (n, 0, 0)),
            ],
            scratch_shapes=[
                pltpu.VMEM((C, tile), jnp.float32),  # num accumulator (lane-wide)
                pltpu.VMEM((C, tile), jnp.float32),  # den accumulator (lane-wide)
            ],
        ),
        compiler_params=pltpu.CompilerParams(
            dimension_semantics=("parallel", "arbitrary"),
            vmem_limit_bytes=32 << 20,
        ),
    )(p, t)

    # Tiny epilogue in plain JAX: combine per-n partials, then Dice.
    num = 2.0 * jnp.sum(num_p, axis=(0, 2)) + smooth   # (C,)
    den = jnp.sum(den_p, axis=(0, 2)) + smooth         # (C,)
    return jnp.sum(1.0 - num / den) / C


def dice_loss_ref(predict, target, smooth=1.0):
    """Pure-JAX reference mirroring the PyTorch DiceLoss forward."""
    p = jax.nn.softmax(predict.astype(jnp.float32), axis=1)
    t = target.astype(jnp.float32)
    C = predict.shape[1]
    total = 0.0
    for i in range(C):
        pi = p[:, i].reshape(p.shape[0], -1)
        ti = t[:, i].reshape(t.shape[0], -1)
        num = jnp.sum(pi * ti) * 2 + smooth
        den = jnp.sum(pi ** 2 + ti ** 2) + smooth
        total = total + (1.0 - num / den)
    return total / C


if __name__ == "__main__":
    key = jax.random.PRNGKey(0)
    k1, k2 = jax.random.split(key)

    N, C, H, W = 2, 4, 16, 16
    predict = jax.random.normal(k1, (N, C, H, W), dtype=jnp.float32)
    labels = jax.random.randint(k2, (N, H, W), 0, C)
    # one-hot target in NCHW, same shape as predict
    target = jnp.transpose(jax.nn.one_hot(labels, C, dtype=jnp.float32), (0, 3, 1, 2))

    loss = jax.block_until_ready(dice_loss(predict, target))
    ref = jax.block_until_ready(dice_loss_ref(predict, target))
    np.testing.assert_allclose(np.asarray(loss), np.asarray(ref), rtol=1e-5, atol=1e-6)

    print("KERNEL_OK")
</pallas_src>

<mosaic_0001>
module attributes {stable_mosaic.version = 11 : i64} {
  func.func @_dice_kernel(%arg0: i32, %arg1: i32, %arg2: memref<1x4x256xf32, #tpu.memory_space<vmem>>, %arg3: memref<1x4x256xbf16, #tpu.memory_space<vmem>>, %arg4: memref<1x4x1xf32, #tpu.memory_space<vmem>>, %arg5: memref<1x4x1xf32, #tpu.memory_space<vmem>>, %arg6: memref<4x256xf32, #tpu.memory_space<vmem>>, %arg7: memref<4x256xf32, #tpu.memory_space<vmem>>) attributes {dimension_semantics = [#tpu.dimension_semantics<parallel>, #tpu.dimension_semantics<arbitrary>], iteration_bounds = array<i64: 2, 1>, scalar_prefetch = 0 : i64, scratch_operands = 2 : i64, tpu.core_type = #tpu.core_type<tc>, window_params = [{transform_indices = @transform_0, window_bounds = array<i64: 1, 4, 256>}, {transform_indices = @transform_1, window_bounds = array<i64: 1, 4, 256>}, {transform_indices = @transform_2, window_bounds = array<i64: 1, 4, 1>}, {transform_indices = @transform_3, window_bounds = array<i64: 1, 4, 1>}]} {
    %c0_i32 = arith.constant 0 : i32
    %0 = arith.cmpi eq, %arg1, %c0_i32 : i32
    %1 = arith.extui %0 : i1 to i32
    %c0_i32_0 = arith.constant 0 : i32
    %2 = arith.cmpi ne, %1, %c0_i32_0 : i32
    scf.if %2 {
      %cst_17 = arith.constant 0.000000e+00 : f32
      %31 = vector.broadcast %cst_17 : f32 to vector<4x256xf32>
      %c0_18 = arith.constant 0 : index
      %c0_19 = arith.constant 0 : index
      %32 = vector.load %arg6[%c0_18, %c0_19] : memref<4x256xf32, #tpu.memory_space<vmem>>, vector<4x256xf32>
      tpu.vector_store %arg6[%c0_18, %c0_19], %31 {strides = array<i32>} : memref<4x256xf32, #tpu.memory_space<vmem>>, vector<4x256xf32>,
      %cst_20 = arith.constant 0.000000e+00 : f32
      %33 = vector.broadcast %cst_20 : f32 to vector<4x256xf32>
      %c0_21 = arith.constant 0 : index
      %c0_22 = arith.constant 0 : index
      %34 = vector.load %arg7[%c0_21, %c0_22] : memref<4x256xf32, #tpu.memory_space<vmem>>, vector<4x256xf32>
      tpu.vector_store %arg7[%c0_21, %c0_22], %33 {strides = array<i32>} : memref<4x256xf32, #tpu.memory_space<vmem>>, vector<4x256xf32>,
    } else {
    }
    %c0 = arith.constant 0 : index
    %c0_1 = arith.constant 0 : index
    %c0_2 = arith.constant 0 : index
    %3 = vector.load %arg2[%c0, %c0_1, %c0_2] : memref<1x4x256xf32, #tpu.memory_space<vmem>>, vector<1x4x256xf32>
    %4 = vector.shape_cast %3 : vector<1x4x256xf32> to vector<4x256xf32>
    %c0_3 = arith.constant 0 : index
    %c0_4 = arith.constant 0 : index
    %c0_5 = arith.constant 0 : index
    %5 = vector.load %arg3[%c0_3, %c0_4, %c0_5] : memref<1x4x256xbf16, #tpu.memory_space<vmem>>, vector<1x4x256xbf16>
    %6 = vector.shape_cast %5 : vector<1x4x256xbf16> to vector<4x256xbf16>
    %7 = arith.extf %6 : vector<4x256xbf16> to vector<4x256xf32>
    %cst = arith.constant dense<0xFF800000> : vector<256xf32>
    %8 = vector.multi_reduction <maximumf>, %4, %cst [0] : vector<4x256xf32> to vector<256xf32>
    %9 = vector.shape_cast %8 : vector<256xf32> to vector<1x256xf32>
    %10 = vector.broadcast %9 : vector<1x256xf32> to vector<4x256xf32>
    %11 = arith.subf %4, %10 : vector<4x256xf32>
    %12 = math.exp %11 : vector<4x256xf32>
    %cst_6 = arith.constant dense<0.000000e+00> : vector<256xf32>
    %13 = vector.multi_reduction <add>, %12, %cst_6 [0] : vector<4x256xf32> to vector<256xf32>
    %14 = vector.shape_cast %13 : vector<256xf32> to vector<1x256xf32>
    %15 = tpu.reciprocal %14 : vector<1x256xf32> -> vector<1x256xf32>
    %16 = vector.broadcast %15 : vector<1x256xf32> to vector<4x256xf32>
    %17 = arith.mulf %12, %16 : vector<4x256xf32>
    %c0_7 = arith.constant 0 : index
    %c0_8 = arith.constant 0 : index
    %18 = vector.load %arg6[%c0_7, %c0_8] : memref<4x256xf32, #tpu.memory_space<vmem>>, vector<4x256xf32>
    %19 = arith.mulf %17, %7 : vector<4x256xf32>
    %20 = arith.addf %18, %19 : vector<4x256xf32>
    %c0_9 = arith.constant 0 : index
    %c0_10 = arith.constant 0 : index
    %21 = vector.load %arg6[%c0_9, %c0_10] : memref<4x256xf32, #tpu.memory_space<vmem>>, vector<4x256xf32>
    tpu.vector_store %arg6[%c0_9, %c0_10], %20 {strides = array<i32>} : memref<4x256xf32, #tpu.memory_space<vmem>>, vector<4x256xf32>,
    %c0_11 = arith.constant 0 : index
    %c0_12 = arith.constant 0 : index
    %22 = vector.load %arg7[%c0_11, %c0_12] : memref<4x256xf32, #tpu.memory_space<vmem>>, vector<4x256xf32>
    %23 = arith.mulf %17, %17 : vector<4x256xf32>
    %24 = arith.mulf %7, %7 : vector<4x256xf32>
    %25 = arith.addf %23, %24 : vector<4x256xf32>
    %26 = arith.addf %22, %25 : vector<4x256xf32>
    %c0_13 = arith.constant 0 : index
    %c0_14 = arith.constant 0 : index
    %27 = vector.load %arg7[%c0_13, %c0_14] : memref<4x256xf32, #tpu.memory_space<vmem>>, vector<4x256xf32>
    tpu.vector_store %arg7[%c0_13, %c0_14], %26 {strides = array<i32>} : memref<4x256xf32, #tpu.memory_space<vmem>>, vector<4x256xf32>,
    %c0_i32_15 = arith.constant 0 : i32
    %28 = arith.cmpi eq, %arg1, %c0_i32_15 : i32
    %29 = arith.extui %28 : i1 to i32
    %c0_i32_16 = arith.constant 0 : i32
    %30 = arith.cmpi ne, %29, %c0_i32_16 : i32
    scf.if %30 {
      %c0_17 = arith.constant 0 : index
      %c0_18 = arith.constant 0 : index
      %31 = vector.load %arg6[%c0_17, %c0_18] : memref<4x256xf32, #tpu.memory_space<vmem>>, vector<4x256xf32>
      %cst_19 = arith.constant dense<0.000000e+00> : vector<4xf32>
      %32 = vector.multi_reduction <add>, %31, %cst_19 [1] : vector<4x256xf32> to vector<4xf32>
      %33 = vector.shape_cast %32 : vector<4xf32> to vector<4x1xf32>
      %34 = vector.shape_cast %33 : vector<4x1xf32> to vector<1x4x1xf32>
      %c0_20 = arith.constant 0 : index
      %c0_21 = arith.constant 0 : index
      %c0_22 = arith.constant 0 : index
      %35 = vector.load %arg4[%c0_20, %c0_21, %c0_22] : memref<1x4x1xf32, #tpu.memory_space<vmem>>, vector<1x4x1xf32>
      tpu.vector_store %arg4[%c0_20, %c0_21, %c0_22], %34 {strides = array<i32>} : memref<1x4x1xf32, #tpu.memory_space<vmem>>, vector<1x4x1xf32>,
      %c0_23 = arith.constant 0 : index
      %c0_24 = arith.constant 0 : index
      %36 = vector.load %arg7[%c0_23, %c0_24] : memref<4x256xf32, #tpu.memory_space<vmem>>, vector<4x256xf32>
      %cst_25 = arith.constant dense<0.000000e+00> : vector<4xf32>
      %37 = vector.multi_reduction <add>, %36, %cst_25 [1] : vector<4x256xf32> to vector<4xf32>
      %38 = vector.shape_cast %37 : vector<4xf32> to vector<4x1xf32>
      %39 = vector.shape_cast %38 : vector<4x1xf32> to vector<1x4x1xf32>
      %c0_26 = arith.constant 0 : index
      %c0_27 = arith.constant 0 : index
      %c0_28 = arith.constant 0 : index
      %40 = vector.load %arg5[%c0_26, %c0_27, %c0_28] : memref<1x4x1xf32, #tpu.memory_space<vmem>>, vector<1x4x1xf32>
      tpu.vector_store %arg5[%c0_26, %c0_27, %c0_28], %39 {strides = array<i32>} : memref<1x4x1xf32, #tpu.memory_space<vmem>>, vector<1x4x1xf32>,
    } else {
    }
    return
  }
  func.func @transform_0(%arg0: i32, %arg1: i32) -> (i32, i32, i32) {
    %c0_i32 = arith.constant 0 : i32
    %c0_i32_0 = arith.constant 0 : i32
    return %arg0, %c0_i32, %arg1 : i32, i32, i32
  }
  func.func @transform_1(%arg0: i32, %arg1: i32) -> (i32, i32, i32) {
    %c0_i32 = arith.constant 0 : i32
    %c0_i32_0 = arith.constant 0 : i32
    return %arg0, %c0_i32, %arg1 : i32, i32, i32
  }
  func.func @transform_2(%arg0: i32, %arg1: i32) -> (i32, i32, i32) {
    %c0_i32 = arith.constant 0 : i32
    %c0_i32_0 = arith.constant 0 : i32
    %c0_i32_1 = arith.constant 0 : i32
    return %arg0, %c0_i32, %c0_i32_0 : i32, i32, i32
  }
  func.func @transform_3(%arg0: i32, %arg1: i32) -> (i32, i32, i32) {
    %c0_i32 = arith.constant 0 : i32
    %c0_i32_0 = arith.constant 0 : i32
    %c0_i32_1 = arith.constant 0 : i32
    return %arg0, %c0_i32, %c0_i32_0 : i32, i32, i32
  }
}

</mosaic_0001>

<bundles_post_ra>
// kernel: tpu_custom_call.1
= control target key start
LH: loop header
LB: loop body
LE: loop exit
PB: predicated region body
PF: predicated region fallthrough
CT: control target
= control target key end

     0   :  { %9 = vsyncpa [#allocation5], 0  ;;  %s887_s0 = inlined_call_operand.hbm [shape: f32[2,4,256], index: 0, kind: input, shape index: {}]   ;;  %s888_s1 = inlined_call_operand.hbm [shape: bf16[2,4,256], index: 1, kind: input, shape index: {}]   ;;  %s889_s2 = inlined_call_operand.vmem [shape: f32[2,4,1], index: 2, kind: output, shape index: {0}]   ;;  %s890_s3 = inlined_call_operand.vmem [shape: f32[2,4,1], index: 3, kind: output, shape index: {1}]  }
   0x1   :  { %11 = vsyncpa [#allocation5 + $0x1], 0 }
   0x2   :  { %12 = vsyncpa [#allocation7], 0 }
   0x3   :  { %14 = vsyncpa [#allocation7 + $0x1], 0  ;;  %s707_s12 = smov 0   ;;  %s709_s13 = smov 0  }
   0x4   :  { %s711_s14 = smov 0   ;;  %s713_s15 = smov 0  }
   0x5   :  { %s715_s16 = smov 0   ;;  %s717_s17 = smov 0  }
   0x6 LB: > { %s483_s18 = sadd.s32 4294967295, %s683_s17   ;;  %s32_s19 = sadd.s32 1, %s679_s16  ;;  %s683_s17 = sphi %s717_s17, %s20_s17   ;;  %s679_s16 = sphi %s715_s16, %s904_s16   ;;  %s675_s15 = sphi %s713_s15, %s903_s15   ;;  %s671_s14 = sphi %s711_s14, %s902_s14   ;;  %s667_s13 = sphi %s709_s13, %s901_s13   ;;  %s663_s12 = sphi %s707_s12, %s900_s12  }
   0x7   : > { %p34_p0 = scmp.ge.s32.totalorder %s32_s19, 2  ;;  %s41_s20 = sadd.s32 1, %s671_s14 }
   0x8   : > { %p48_p1 = scmp.ne.s32.totalorder %s671_s14, %s667_s13  ;;  %p49_p2 = scmp.eq.s32.totalorder %s683_s17, 0 }
   0x9   : > { %s906_s19 = smov (%p34_p0, %s32_s19), 0  ;;  %p54_p4 = scmp.ne.s32.totalorder %s667_s13, %s663_s12 }
   0xa   : > { %p743_p3 = por %p49_p2, %p48_p1  ;;  %s36_s22 = ssub.s32 %s679_s16, %s906_s19 }
   0xb   : > { %p55_p5 = scmp.eq.s32.totalorder %s483_s18, 0  ;;  %p39_p6 = scmp.eq.s32.totalorder %s36_s22, 0 }
   0xc   : > { %p513_p8 = scmp.lt.s32.totalorder %s683_s17, 2  ;;  %s759_s25 = sand.u32 1, %s671_s14  }
   0xd   : > { %p750_p7 = por %p55_p5, %p54_p4  ;;  %s500_s26 = sshll.u32 %s679_s16, 7 }
   0xe   : > { %s756_s24 = scalar_select %p39_p6, %s671_s14, %s41_s20  }
   0xf   : > { %s893_s23 = scalar_select %p750_p7, 1, 0 }
  0x10   : > { %s487_s27 = sshll.u32 %s759_s25, 3  ;;  %s766_s30 = scalar_lea.hbm %s887_s0, %s500_s26 }
  0x11   : > { %s162_s4 = scalar_lea.vmem [#allocation4], %s487_s27  ;;  %p770_p9 = pnand %p513_p8, %p743_p3 }
  0x12   : > { %s172_s5 = sshll.u32 %s162_s4, 4  ;;  %s159_s7 = scalar_lea.sflag [#allocation5], %s759_s25  ;;  %s774_s5 = int_to_ptr.vmem [resolvable:$true] %s172_s5 }
  0x13   : > { %s569_s8 = scalar_lea.hbm %s766_s30, 128  ;;  %p571_p13 = pneg %p770_p9 }
  0x14   : > { %p570_p12 = scmp.ne.s32.totalorder %s766_s30, %s569_s8  ;;  %s574_s11 = scalar_lea.hbm %s887_s0, 256 }
  0x15   : > { %p575_p2 = scmp.lt.u32.totalorder %s766_s30, %s887_s0  ;;  %p576_p3 = scmp.lt.u32.totalorder %s574_s11, %s569_s8 }
  0x16   : > { %p572_p0 = pnand %p571_p13, %p570_p12  ;;  %p578_p5 = scmp.lt.u32.totalorder %s569_s8, %s766_s30 }
  0x17   : > { %p577_p4 = por %p576_p3, %p575_p2 }
  0x18   : > { %p573_p1 = pneg %p572_p0 }
  0x19   : > { %p579_p6 = por %p578_p5, %p577_p4 }
  0x1b   : > { %p580_p8 = pnand %p579_p6, %p573_p1 }
  0x1d   : > { %583 = shalt.err (!%p580_p8)
}
  0x1e   : > { %s584_s20 = scalar_lea.vmem %s774_s5, 128  ;;  %s685_s21 = smov [#allocation4]  }
  0x1f   : > { %p585_p12 = scmp.ne.s32.totalorder %s774_s5, %s584_s20  ;;  %s589_s22 = sshll.u32 %s685_s21, 4  ;;  %s590_s22 = int_to_ptr.vmem [resolvable:$false] %s589_s22 }
  0x20   : > { %s591_s26 = scalar_lea.vmem %s590_s22, 256  ;;  %p592_p11 = scmp.lt.s32.totalorder %s774_s5, %s590_s22 }
  0x21   : > { %p587_p0 = pnand %p585_p12, %p571_p13  ;;  %p593_p2 = scmp.lt.s32.totalorder %s591_s26, %s584_s20 }
  0x23   : > { %p588_p10 = pneg %p587_p0  ;;  %p594_p3 = por %p593_p2, %p592_p11 }
  0x25   : > { %p595_p4 = pnand %p594_p3, %p588_p10 }
  0x27   : > { %598 = shalt.err (!%p595_p4)
}
  0x28   : > { %509 = dma.hbm_to_vmem [thread:$0]  (!%p770_p9), %s766_s30, 128, %s774_s5, %s159_s7  }
  0x29   : > { %p895_p1 = scmp.lt.s32.totalorder %s683_s17, 3  ;;  %p896_p5 = scmp.ge.s32.totalorder %s683_s17, 1 }
  0x2a   : > { %s490_s28 = sshll.u32 %s759_s25, 2  ;;  %s501_s29 = sshll.u32 %s679_s16, 6 }
  0x2b   : > { %p808_p6 = pnand %p896_p5, %p895_p1  ;;  %s817_s9 = scalar_lea.hbm %s888_s1, %s501_s29 }
  0x2c   : > { %s183_s10 = scalar_lea.vmem [#allocation6], %s490_s28  ;;  %s180_s30 = scalar_lea.sflag [#allocation7], %s759_s25 }
  0x2d   : > { %s897_s27 = scalar_select %p808_p6, 1, 0 }
  0x2e   : > { %s193_s11 = sshll.u32 %s183_s10, 4  ;;  %s599_s5 = scalar_lea.hbm %s817_s9, 64  ;;  %s194_s11 = int_to_ptr.vmem [resolvable:$true] %s193_s11 }
  0x2f   : > { %p600_p10 = scmp.ne.s32.totalorder %s817_s9, %s599_s5  ;;  %s604_s18 = scalar_lea.hbm %s888_s1, 128 }
  0x30   : > { %p605_p12 = scmp.lt.u32.totalorder %s817_s9, %s888_s1  ;;  %p606_p0 = scmp.lt.u32.totalorder %s604_s18, %s599_s5 }
  0x31   : > { %p602_p11 = pnand %p600_p10, %p571_p13  ;;  %p608_p3 = scmp.lt.u32.totalorder %s599_s5, %s817_s9 }
  0x32   : > { %p607_p2 = por %p606_p0, %p605_p12 }
  0x33   : > { %p603_p8 = pneg %p602_p11 }
  0x34   : > { %p609_p4 = por %p608_p3, %p607_p2 }
  0x36   : > { %p610_p1 = pnand %p609_p4, %p603_p8 }
  0x38   : > { %613 = shalt.err (!%p610_p1)
}
  0x39   : > { %s614_s25 = scalar_lea.vmem %s194_s11, 64  ;;  %s686_s22 = smov [#allocation6]  }
  0x3a   : > { %p615_p5 = scmp.ne.s32.totalorder %s194_s11, %s614_s25  ;;  %s619_s26 = sshll.u32 %s686_s22, 4  ;;  %s620_s26 = int_to_ptr.vmem [resolvable:$false] %s619_s26 }
  0x3b   : > { %s621_s28 = scalar_lea.vmem %s620_s26, 128  ;;  %p622_p7 = scmp.lt.s32.totalorder %s194_s11, %s620_s26 }
  0x3c   : > { %p617_p10 = pnand %p615_p5, %p571_p13  ;;  %p623_p6 = scmp.lt.s32.totalorder %s621_s28, %s614_s25 }
  0x3e   : > { %p618_p11 = pneg %p617_p10  ;;  %p624_p0 = por %p623_p6, %p622_p7 }
  0x40   : > { %p625_p12 = pnand %p624_p0, %p618_p11 }
  0x42   : > { %628 = shalt.err (!%p625_p12)
}
  0x43   : > { %512 = dma.hbm_to_vmem [thread:$0]  (!%p770_p9), %s817_s9, 64, %s194_s11, %s180_s30  }
  0x44   : > { %p898_p8 = scmp.ne.s32.totalorder %s897_s27, 0 }
  0x45   : > { %s204_s29 = sand.u32 (!%p898_p8), 1, %s667_s13   ;;  %p899_p13 = scmp.ne.s32.totalorder (!%p898_p8), %s893_s23, 0 }
  0x46   : > { %202 = sbr.rel (%p898_p8) target bundleno = 298 (0x12a), region = 28  ;;  %s494_s4 = sshll.u32 (!%p898_p8), %s204_s29, 3 }
  0x47   : > { %s205_s8 = scalar_lea.sflag (!%p898_p8), [#allocation5], %s204_s29  ;;  %s208_s10 = scalar_lea.vmem (!%p898_p8), [#allocation4], %s494_s4 }
  0x4d   : > { %654 = dma.done.wait (%p899_p13), %s205_s8, 128  }
  0x4e   : > { %656 = vsyncadd (%p899_p13), %s205_s8, 4294967168  ;;  %s495_s5 = sshll.u32 %s204_s29, 2  ;;  %s214_s7 = scalar_lea.sflag [#allocation7], %s204_s29 }
  0x4f   : > { %s846_s6 = scalar_lea.vmem [#allocation6], %s495_s5 }
  0x50   : > { %658 = dma.done.wait (%p899_p13), %s214_s7, 64  }
  0x51   : > { %660 = vsyncadd (%p899_p13), %s214_s7, 4294967232  ;;  %vm270_vm0 = vcmask 1043456   ;;  %v264_v0 = vld [vmem:[%s208_s10] sm:$0xff]  ;;  %v265_v36 = vld [vmem:[%s846_s6] sm:$0xf]  ;;  %p250_p7 = scmp.lt.s32.totalorder %s675_s15, 1 }
  0x52   : > { %v268_v1 = vcombine.high %v264_v0, %v264_v0  ;;  %v271_v2 = vsel %vm270_vm0, %v264_v0, -inf  ;;  %v266_v38 = vunpack.c.l.bf16 %v265_v36  ;;  %vm338_vm1 = vcmask 3072  }
  0x53   : > { %v272_v3 = vrot.slane %v271_v2, 4  ;;  %s908_s15 = smov (!%p250_p7, %s675_s15), 1 }
  0x54   : > { %v278_v4 = vsel %vm270_vm0, %v268_v1, -inf  ;;  %v322_v41 = vmul.f32 %v266_v38, %v266_v38  ;;  %s496_s23 = sshll.u32 %s908_s15, 2 }
  0x55   : > { %v273_v5 = vmax.f32 %v271_v2, %v272_v3  ;;  %v279_v6 = vrot.slane %v278_v4, 4  ;;  %s253_s11 = scalar_lea.vmem %s889_s2, %s496_s23  ;;  %s257_s18 = scalar_lea.vmem %s890_s3, %s496_s23 }
  0x57   : > { %v274_v7 = vrot.slane %v273_v5, 2  ;;  %v280_v8 = vmax.f32 %v278_v4, %v279_v6 }
  0x59   : > { %v275_v9 = vmax.f32 %v273_v5, %v274_v7  ;;  %v281_v10 = vrot.slane %v280_v8, 2 }
  0x5b   : > { %v276_v11 = vrot.slane %v275_v9, 1  ;;  %v282_v12 = vmax.f32 %v280_v8, %v281_v10 }
  0x5d   : > { %v277_v13 = vmax.f32 %v275_v9, %v276_v11  ;;  %v283_v14 = vrot.slane %v282_v12, 1 }
  0x5f   : > { %v284_v15 = vmax.f32 %v282_v12, %v283_v14 }
  0x61   : > { %v287_v16 = vcombine.low %v277_v13, %v284_v15 }
  0x63   : > { %v289_v17 = vsub.f32 %v264_v0, %v287_v16 }
  0x65   : > { %v290_v18 = vmul.f32 1.442695, %v289_v17 }
  0x67   : > { %563 = vpow2.f32 %v290_v18 }
  0x71   : > { %v564_v19 = vpop.eup %563 }
  0x72   : > { %v293_v20 = vcombine.high %v564_v19, %v564_v19  ;;  %v295_v21 = vsel %vm270_vm0, %v564_v19, 0.0 }
  0x73   : > { %v296_v22 = vrot.slane %v295_v21, 4 }
  0x74   : > { %v302_v23 = vsel %vm270_vm0, %v293_v20, 0.0 }
  0x75   : > { %v297_v24 = vadd.f32 %v296_v22, %v295_v21  ;;  %v303_v25 = vrot.slane %v302_v23, 4 }
  0x77   : > { %v298_v26 = vrot.slane %v297_v24, 2  ;;  %v304_v27 = vadd.f32 %v303_v25, %v302_v23 }
  0x79   : > { %v299_v28 = vadd.f32 %v298_v26, %v297_v24  ;;  %v305_v29 = vrot.slane %v304_v27, 2 }
  0x7b   : > { %v300_v30 = vrot.slane %v299_v28, 1  ;;  %v306_v31 = vadd.f32 %v305_v29, %v304_v27 }
  0x7d   : > { %v301_v32 = vadd.f32 %v300_v30, %v299_v28  ;;  %v307_v33 = vrot.slane %v306_v31, 1 }
  0x7f   : > { %v308_v34 = vadd.f32 %v307_v33, %v306_v31  ;;  %565 = vrcp.f32 %v301_v32 }
  0x81   : > { %567 = vrcp.f32 %v308_v34 }
  0x89   : > { %v566_v35 = vpop.eup %565 }
  0x8b   : > { %v568_v37 = vpop.eup %567 }
  0x8c   : > { %v313_v39 = vcombine.low %v566_v35, %v568_v37 }
  0x8e   : > { %v315_v40 = vmul.f32 %v564_v19, %v313_v39 }
  0x90   : > { %v317_v42 = vmul.f32 %v315_v40, %v266_v38  ;;  %v321_v43 = vmul.f32 %v315_v40, %v315_v40 }
  0x92   : > { %v331_v44 = vcombine.high %v317_v42, %v317_v42  ;;  %v333_v45 = vsel %vm270_vm0, %v317_v42, 0.0  ;;  %v323_v46 = vadd.f32 %v322_v41, %v321_v43 }
  0x94   : > { %v334_v47 = vsel %vm270_vm0, %v331_v44, 0.0  ;;  %v342_v48 = vcombine.high %v323_v46, %v323_v46  ;;  %v344_v49 = vsel %vm270_vm0, %v323_v46, 0.0 }
  0x95   : > { %v335_v50 = vadd.f32 %v334_v47, %v333_v45 }
  0x96   : > { %v345_v51 = vsel %vm270_vm0, %v342_v48, 0.0 }
  0x97   : > { %336 = vadd.xlane.f32.xlu0 %v335_v50  ;;  %v346_v52 = vadd.f32 %v345_v51, %v344_v49 }
  0x9b   : > { %347 = vadd.xlane.f32.xlu0 %v346_v52 }
 0x124   : > { %v337_v53 = vpop.xlane.xlu0 %336 }
 0x125   : > { %339 = vst.msk [vmem:[%s253_s11] sm:$0xf] %vm338_vm1, %v337_v53 }
 0x128   : > { %v348_v54 = vpop.xlane.xlu0 %347 }
 0x129   : > { %349 = vst.msk [vmem:[%s257_s18] sm:$0xf] %vm338_vm1, %v348_v54 }
 0x12a PF: > { %s20_s17 = sadd.s32 1, %s683_s17   ;;  %s900_s12 = smov %s667_s13 }
 0x12b   : > { %p17_p9 = scmp.ge.s32.totalorder %s20_s17, 4   ;;  %s901_s13 = smov %s671_s14 }
 0x12c   : > { %s902_s14 = smov %s756_s24  ;;  %s903_s15 = smov %s679_s16 }
 0x12d   : > { %s904_s16 = smov %s906_s19  ;;  %19 = sbr.rel (!%p17_p9) target bundleno = 6 (0x6), region = 101 }
 0x134   :  { %383 = vsyncpa [#allocation5], 1 }
 0x135   :  { %385 = vsyncpa [#allocation5 + $0x1], 1 }
 0x136   :  { %386 = vsyncpa [#allocation7], 1 }
 0x137   :  { %388 = vsyncpa [#allocation7 + $0x1], 1 }

</bundles_post_ra>
